<compile_context>
chip_gen: v5e
topology: v5e:2x2
jax: 0.10.0
libtpu: 0.0.40
codegen_flags: <defaults>
</compile_context>

<pallas_src>
import functools

import jax
import jax.numpy as jnp
from jax.experimental import pallas as pl
from jax.experimental.pallas import tpu as pltpu

LANE = 128
SUB = 8


def _round_up(x, m):
    return ((x + m - 1) // m) * m


def simreg_kernel(imq_ref, imt_ref,
                  wq_ref, bq_ref,            # student encoder tail
                  wt_ref, bt_ref,            # teacher encoder tail (frozen)
                  w1_ref, b1_ref,            # predictor MLP layer 1
                  w2_ref, b2_ref,            # predictor MLP layer 2
                  loss_ref,                  # (1, 8, 128) per-batch-tile partial
                  poolq_acc, poolt_acc,      # (TB, C) f32 scratch
                  *, hw, batch, tb):
    # Grid coordinates are read at the TOP LEVEL only (not inside pl.when
    # bodies): program_id staged inside a cond branch has no lowering rule on
    # the CPU/interpret fallback and crashed the previous version.
    bi = pl.program_id(0)
    s = pl.program_id(1)
    ns = pl.num_programs(1)

    @pl.when(s == 0)
    def _init():
        poolq_acc[...] = jnp.zeros_like(poolq_acc)
        poolt_acc[...] = jnp.zeros_like(poolt_acc)

    # Global-average-pool partial sums in f32 (cast happens in VMEM, so the
    # HBM DMA stays at the image's native dtype).
    poolq_acc[...] += jnp.sum(imq_ref[...].astype(jnp.float32), axis=-1)
    poolt_acc[...] += jnp.sum(imt_ref[...].astype(jnp.float32), axis=-1)

    @pl.when(s == ns - 1)
    def _finalize():
        inv_hw = jnp.float32(1.0 / hw)
        # bf16 MXU inputs, f32 accumulation.
        pooled_q = (poolq_acc[...] * inv_hw).astype(jnp.bfloat16)
        pooled_t = (poolt_acc[...] * inv_hw).astype(jnp.bfloat16)

        # ---- student: encoder_q tail (GAP + linear) -> feat_q ----
        feat_q = jnp.dot(pooled_q, wq_ref[...],
                         preferred_element_type=jnp.float32) + bq_ref[...]

        # ---- predict_q: MLP [Dq -> 2*Dq -> Dt] (n_mlp_layers == 2) ----
        h = jnp.dot(feat_q.astype(jnp.bfloat16), w1_ref[...],
                    preferred_element_type=jnp.float32) + b1_ref[...]
        h = jnp.maximum(h, 0.0)                                   # ReLU
        query = jnp.dot(h.astype(jnp.bfloat16), w2_ref[...],
                        preferred_element_type=jnp.float32) + b2_ref[...]

        # ---- teacher (no-grad): encoder_t tail -> target ----
        target = jnp.dot(pooled_t, wt_ref[...],
                         preferred_element_type=jnp.float32) + bt_ref[...]

        # F.normalize(x, dim=1, eps=1e-12) == x * rsqrt(max(|x|^2, eps^2));
        # rsqrt runs on the otherwise-idle EUP slot; math stays f32.
        eps2 = jnp.float32(1e-24)
        qn = query * jax.lax.rsqrt(
            jnp.maximum(jnp.sum(query * query, axis=-1, keepdims=True), eps2))
        tn = target * jax.lax.rsqrt(
            jnp.maximum(jnp.sum(target * target, axis=-1, keepdims=True), eps2))

        # dist = 2 - 2 * einsum('bc,bc->b', query, target); mask pad rows.
        dist = 2.0 - 2.0 * jnp.sum(qn * tn, axis=-1, keepdims=True)  # (TB,1)
        row = bi * tb + jax.lax.broadcasted_iota(jnp.int32, (tb, 1), 0)
        dist = jnp.where(row < batch, dist, 0.0)

        # Lane-dense (1, 8, 128) store of this batch tile's partial loss sum.
        loss_ref[...] = jnp.broadcast_to(jnp.sum(dist), loss_ref.shape)


def _pad2(x, rows, cols, dtype):
    out = jnp.zeros((rows, cols), dtype)
    return out.at[:x.shape[0], :x.shape[1]].set(x.astype(dtype))


def _pick_tiles(B_pad, C, HW, itemsize, weight_bytes, spatial_tile):
    """Choose (TB, THW, vmem_limit) from the per-generation VMEM capacity."""
    # Sublane packing of the image dtype: f32 -> 8, bf16 -> 16, int8 -> 32.
    pack = SUB * max(1, 4 // itemsize)
    C_pad = _round_up(C, pack)

    def tile_bytes(tb, thw):
        return tb * C_pad * _round_up(thw, LANE) * itemsize

    try:
        vmem_cap = int(pltpu.get_tpu_info().vmem_capacity_bytes)
    except Exception:  # not on a TPU device (e.g. interpret mode on CPU)
        vmem_cap = 64 << 20
    # ~48 MiB on v7x (64 MiB VMEM/TC), ~96 MiB on v5e/v6e (128 MiB VMEM).
    vmem_limit = max(32 << 20, min((vmem_cap * 3) // 4, 100 << 20))
    # Budget for the 2 image inputs x 2 pipeline buffers; leave room for the
    # (double-buffered) resident weights, scratch and compiler headroom.
    img_budget = max(4 << 20, vmem_limit - 2 * weight_bytes - (4 << 20))

    # Batch-tile candidates: multiples of 8 dividing B_pad, capped at 128.
    cands = [d for d in range(SUB, min(B_pad, 128) + 1, SUB) if B_pad % d == 0]
    # Keep >= 2 batch tiles when possible so v7x's 2 TensorCores both stream
    # (the "parallel" axis is sharded across cores); no-op cost on v5e/v6e.
    if B_pad >= 2 * SUB:
        cands = [d for d in cands if d <= B_pad // 2] or [SUB]
    cands.sort(reverse=True)

    if spatial_tile is not None:
        assert HW % spatial_tile == 0, "spatial tile must divide H*W"
        tb = next((d for d in cands
                   if 4 * tile_bytes(d, spatial_tile) <= img_budget), cands[-1])
        return tb, spatial_tile, vmem_limit

    # Prefer THW == HW: each sample's (C, HW) slab is contiguous in HBM, so
    # full-HW blocks DMA as long contiguous runs. Shrink TB before tiling HW.
    tb = next((d for d in cands if 4 * tile_bytes(d, HW) <= img_budget), None)
    if tb is not None:
        return tb, HW, vmem_limit

    # Forced to tile spatially: smallest batch tile, largest 128-multiple
    # divisor of HW that fits the budget.
    tb = cands[-1]
    thw = HW
    if HW % LANE == 0:
        while (4 * tile_bytes(tb, thw) > img_budget
               and thw % 2 == 0 and (thw // 2) % LANE == 0):
            thw //= 2
    return tb, thw, vmem_limit


def simreg_loss(im_q, im_t, params, *, spatial_tile=None):
    B, C, H, W = im_q.shape
    HW = H * W
    itemsize = im_q.dtype.itemsize

    # Reshape only (no dtype cast -> no extra HBM copy, no doubled DMA).
    imq3 = im_q.reshape(B, C, HW)
    imt3 = im_t.reshape(B, C, HW)

    # Pad batch to a multiple of 8 sublanes; padded rows are masked in-kernel.
    B_pad = _round_up(B, SUB)
    if B_pad != B:
        pad = ((0, B_pad - B), (0, 0), (0, 0))
        imq3 = jnp.pad(imq3, pad)
        imt3 = jnp.pad(imt3, pad)

    # Zero-pad the (tiny) feature dims to 128 lanes (numerically exact) and
    # store weights as bf16 for the MXU; biases stay f32.
    Dq = params["wq"].shape[1]
    Dt = params["wt"].shape[1]
    Hd = params["w1"].shape[1]
    Dq_p, Dt_p, Hd_p = (_round_up(d, LANE) for d in (Dq, Dt, Hd))

    wq_p = _pad2(params["wq"], C, Dq_p, jnp.bfloat16)
    bq_p = _pad2(params["bq"], 1, Dq_p, jnp.float32)
    wt_p = _pad2(params["wt"], C, Dt_p, jnp.bfloat16)
    bt_p = _pad2(params["bt"], 1, Dt_p, jnp.float32)
    w1_p = _pad2(params["w1"], Dq_p, Hd_p, jnp.bfloat16)
    b1_p = _pad2(params["b1"], 1, Hd_p, jnp.float32)
    w2_p = _pad2(params["w2"], Hd_p, Dt_p, jnp.bfloat16)
    b2_p = _pad2(params["b2"], 1, Dt_p, jnp.float32)
    weight_args = (wq_p, bq_p, wt_p, bt_p, w1_p, b1_p, w2_p, b2_p)
    weight_bytes = int(sum(w.size * w.dtype.itemsize for w in weight_args))

    TB, THW, vmem_limit = _pick_tiles(B_pad, C, HW, itemsize, weight_bytes,
                                      spatial_tile)
    NB = B_pad // TB
    NS = HW // THW

    img_spec = pl.BlockSpec((TB, C, THW), lambda b, s: (b, 0, s))

    def resident(shape):
        # Weights/biases loaded once and kept resident in VMEM for all steps.
        return pl.BlockSpec(shape, lambda b, s: (0, 0))

    flops = int(2 * 2 * B_pad * C * HW
                + 2 * B_pad * (C * Dq_p + Dq_p * Hd_p + Hd_p * Dt_p + C * Dt_p)
                + 12 * B_pad * Dt_p)
    bytes_accessed = int(2 * B_pad * C * HW * itemsize + weight_bytes
                         + NB * SUB * LANE * 4)

    partial = pl.pallas_call(
        functools.partial(simreg_kernel, hw=HW, batch=B, tb=TB),
        out_shape=jax.ShapeDtypeStruct((NB, SUB, LANE), jnp.float32),
        grid=(NB, NS),
        in_specs=[img_spec, img_spec] + [resident(w.shape) for w in weight_args],
        out_specs=pl.BlockSpec((1, SUB, LANE), lambda b, s: (b, 0, 0)),
        scratch_shapes=[pltpu.VMEM((TB, C), jnp.float32),
                        pltpu.VMEM((TB, C), jnp.float32)],
        compiler_params=pltpu.CompilerParams(
            dimension_semantics=("parallel", "arbitrary"),
            vmem_limit_bytes=int(vmem_limit)),
        cost_estimate=pl.CostEstimate(flops=flops, transcendentals=2 * B_pad,
                                      bytes_accessed=bytes_accessed),
    )(imq3, imt3, *weight_args)

    # Per-batch-tile partial sums -> mean over the true batch size.
    return jnp.sum(partial[:, 0, 0]) / jnp.float32(B)


def simreg_loss_ref(im_q, im_t, params):
    """Pure-JAX reference mirroring the kernel's bf16-MXU / f32-accum math."""
    B, C, H, W = im_q.shape
    bf = jnp.bfloat16
    pooled_q = jnp.mean(im_q.reshape(B, C, -1).astype(jnp.float32), axis=-1)
    pooled_t = jnp.mean(im_t.reshape(B, C, -1).astype(jnp.float32), axis=-1)

    def lin(x, w, b):
        return jnp.dot(x.astype(bf), w.astype(bf),
                       preferred_element_type=jnp.float32) + b

    feat_q = lin(pooled_q, params["wq"], params["bq"])
    h = jnp.maximum(lin(feat_q, params["w1"], params["b1"]), 0.0)
    query = lin(h, params["w2"], params["b2"])
    target = lin(pooled_t, params["wt"], params["bt"])

    def l2n(x):
        n = jnp.sqrt(jnp.sum(x * x, axis=-1, keepdims=True))
        return x / jnp.maximum(n, 1e-12)

    dist = 2.0 - 2.0 * jnp.sum(l2n(query) * l2n(target), axis=-1)
    return jnp.mean(dist)


def init_params(key, C, feat_dim_q, feat_dim_t):
    hidden = 2 * feat_dim_q  # hidden_dims = [feat_dim_q, feat_dim_q * 2]
    ks = jax.random.split(key, 4)

    def lin(k, fan_in, fan_out):
        scale = 1.0 / jnp.sqrt(jnp.float32(fan_in))
        return jax.random.uniform(k, (fan_in, fan_out), jnp.float32,
                                  -scale, scale)

    return {
        "wq": lin(ks[0], C, feat_dim_q),
        "bq": jnp.zeros((1, feat_dim_q), jnp.float32),
        "wt": lin(ks[1], C, feat_dim_t),
        "bt": jnp.zeros((1, feat_dim_t), jnp.float32),
        "w1": lin(ks[2], feat_dim_q, hidden),
        "b1": jnp.full((1, hidden), 0.01, jnp.float32),
        "w2": lin(ks[3], hidden, feat_dim_t),
        "b2": jnp.zeros((1, feat_dim_t), jnp.float32),
    }


if __name__ == "__main__":
    B, C, H, W = 2, 4, 16, 16
    feat_dim_q, feat_dim_t = 32, 48

    key = jax.random.PRNGKey(0)
    k_imq, k_imt, k_par = jax.random.split(key, 3)

    im_q = jax.random.normal(k_imq, (B, C, H, W), jnp.float32)
    im_t = jax.random.normal(k_imt, (B, C, H, W), jnp.float32)
    params = init_params(k_par, C, feat_dim_q, feat_dim_t)

    # spatial_tile=128 exercises the multi-step spatial reduction (H*W = 256).
    loss_fn = jax.jit(functools.partial(simreg_loss, spatial_tile=128))
    loss = loss_fn(im_q, im_t, params)
    jax.block_until_ready(loss)

    ref = simreg_loss_ref(im_q, im_t, params)
    assert loss.shape == () and bool(jnp.isfinite(loss))
    assert jnp.allclose(loss, ref, atol=2e-2, rtol=2e-2), (loss, ref)
    print("KERNEL_OK")
</pallas_src>

<mosaic_0001>
module attributes {stable_mosaic.version = 11 : i64} {
  func.func @simreg_kernel(%arg0: i32, %arg1: i32, %arg2: memref<8x4x128xf32, #tpu.memory_space<vmem>>, %arg3: memref<8x4x128xf32, #tpu.memory_space<vmem>>, %arg4: memref<4x128xbf16, #tpu.memory_space<vmem>>, %arg5: memref<1x128xf32, #tpu.memory_space<vmem>>, %arg6: memref<4x128xbf16, #tpu.memory_space<vmem>>, %arg7: memref<1x128xf32, #tpu.memory_space<vmem>>, %arg8: memref<128x128xbf16, #tpu.memory_space<vmem>>, %arg9: memref<1x128xf32, #tpu.memory_space<vmem>>, %arg10: memref<128x128xbf16, #tpu.memory_space<vmem>>, %arg11: memref<1x128xf32, #tpu.memory_space<vmem>>, %arg12: memref<1x8x128xf32, #tpu.memory_space<vmem>>, %arg13: memref<8x4xf32, #tpu.memory_space<vmem>>, %arg14: memref<8x4xf32, #tpu.memory_space<vmem>>) attributes {dimension_semantics = [#tpu.dimension_semantics<parallel>, #tpu.dimension_semantics<arbitrary>], iteration_bounds = array<i64: 1, 2>, scalar_prefetch = 0 : i64, scratch_operands = 2 : i64, tpu.core_type = #tpu.core_type<tc>, window_params = [{transform_indices = @transform_0, window_bounds = array<i64: 8, 4, 128>}, {transform_indices = @transform_1, window_bounds = array<i64: 8, 4, 128>}, {pipeline_mode = #tpu.pipeline_mode<synchronous>, transform_indices = @transform_2, window_bounds = array<i64: 4, 128>}, {pipeline_mode = #tpu.pipeline_mode<synchronous>, transform_indices = @transform_3, window_bounds = array<i64: 1, 128>}, {pipeline_mode = #tpu.pipeline_mode<synchronous>, transform_indices = @transform_4, window_bounds = array<i64: 4, 128>}, {pipeline_mode = #tpu.pipeline_mode<synchronous>, transform_indices = @transform_5, window_bounds = array<i64: 1, 128>}, {pipeline_mode = #tpu.pipeline_mode<synchronous>, transform_indices = @transform_6, window_bounds = array<i64: 128, 128>}, {pipeline_mode = #tpu.pipeline_mode<synchronous>, transform_indices = @transform_7, window_bounds = array<i64: 1, 128>}, {pipeline_mode = #tpu.pipeline_mode<synchronous>, transform_indices = @transform_8, window_bounds = array<i64: 128, 128>}, {pipeline_mode = #tpu.pipeline_mode<synchronous>, transform_indices = @transform_9, window_bounds = array<i64: 1, 128>}, {transform_indices = @transform_10, window_bounds = array<i64: 1, 8, 128>}]} {
    %c0_i32 = arith.constant 0 : i32
    %0 = arith.cmpi eq, %arg1, %c0_i32 : i32
    %1 = arith.extui %0 : i1 to i32
    %c0_i32_0 = arith.constant 0 : i32
    %2 = arith.cmpi ne, %1, %c0_i32_0 : i32
    scf.if %2 {
      %cst_16 = arith.constant 0.000000e+00 : f32
      %16 = vector.broadcast %cst_16 : f32 to vector<8x4xf32>
      %c0_17 = arith.constant 0 : index
      %c0_18 = arith.constant 0 : index
      %17 = vector.load %arg13[%c0_17, %c0_18] : memref<8x4xf32, #tpu.memory_space<vmem>>, vector<8x4xf32>
      tpu.vector_store %arg13[%c0_17, %c0_18], %16 {strides = array<i32>} : memref<8x4xf32, #tpu.memory_space<vmem>>, vector<8x4xf32>,
      %cst_19 = arith.constant 0.000000e+00 : f32
      %18 = vector.broadcast %cst_19 : f32 to vector<8x4xf32>
      %c0_20 = arith.constant 0 : index
      %c0_21 = arith.constant 0 : index
      %19 = vector.load %arg14[%c0_20, %c0_21] : memref<8x4xf32, #tpu.memory_space<vmem>>, vector<8x4xf32>
      tpu.vector_store %arg14[%c0_20, %c0_21], %18 {strides = array<i32>} : memref<8x4xf32, #tpu.memory_space<vmem>>, vector<8x4xf32>,
    } else {
    }
    %c0 = arith.constant 0 : index
    %c0_1 = arith.constant 0 : index
    %3 = vector.load %arg13[%c0, %c0_1] : memref<8x4xf32, #tpu.memory_space<vmem>>, vector<8x4xf32>
    %c0_2 = arith.constant 0 : index
    %c0_3 = arith.constant 0 : index
    %c0_4 = arith.constant 0 : index
    %4 = vector.load %arg2[%c0_2, %c0_3, %c0_4] : memref<8x4x128xf32, #tpu.memory_space<vmem>>, vector<8x4x128xf32>
    %cst = arith.constant dense<0.000000e+00> : vector<8x4xf32>
    %5 = vector.multi_reduction <add>, %4, %cst [2] : vector<8x4x128xf32> to vector<8x4xf32>
    %6 = arith.addf %3, %5 : vector<8x4xf32>
    %c0_5 = arith.constant 0 : index
    %c0_6 = arith.constant 0 : index
    %7 = vector.load %arg13[%c0_5, %c0_6] : memref<8x4xf32, #tpu.memory_space<vmem>>, vector<8x4xf32>
    tpu.vector_store %arg13[%c0_5, %c0_6], %6 {strides = array<i32>} : memref<8x4xf32, #tpu.memory_space<vmem>>, vector<8x4xf32>,
    %c0_7 = arith.constant 0 : index
    %c0_8 = arith.constant 0 : index
    %8 = vector.load %arg14[%c0_7, %c0_8] : memref<8x4xf32, #tpu.memory_space<vmem>>, vector<8x4xf32>
    %c0_9 = arith.constant 0 : index
    %c0_10 = arith.constant 0 : index
    %c0_11 = arith.constant 0 : index
    %9 = vector.load %arg3[%c0_9, %c0_10, %c0_11] : memref<8x4x128xf32, #tpu.memory_space<vmem>>, vector<8x4x128xf32>
    %cst_12 = arith.constant dense<0.000000e+00> : vector<8x4xf32>
    %10 = vector.multi_reduction <add>, %9, %cst_12 [2] : vector<8x4x128xf32> to vector<8x4xf32>
    %11 = arith.addf %8, %10 : vector<8x4xf32>
    %c0_13 = arith.constant 0 : index
    %c0_14 = arith.constant 0 : index
    %12 = vector.load %arg14[%c0_13, %c0_14] : memref<8x4xf32, #tpu.memory_space<vmem>>, vector<8x4xf32>
    tpu.vector_store %arg14[%c0_13, %c0_14], %11 {strides = array<i32>} : memref<8x4xf32, #tpu.memory_space<vmem>>, vector<8x4xf32>,
    %c1_i32 = arith.constant 1 : i32
    %13 = arith.cmpi eq, %arg1, %c1_i32 : i32
    %14 = arith.extui %13 : i1 to i32
    %c0_i32_15 = arith.constant 0 : i32
    %15 = arith.cmpi ne, %14, %c0_i32_15 : i32
    scf.if %15 {
      %c0_16 = arith.constant 0 : index
      %c0_17 = arith.constant 0 : index
      %16 = vector.load %arg13[%c0_16, %c0_17] : memref<8x4xf32, #tpu.memory_space<vmem>>, vector<8x4xf32>
      %cst_18 = arith.constant 3.906250e-03 : f32
      %17 = vector.broadcast %cst_18 : f32 to vector<8x4xf32>
      %18 = arith.mulf %16, %17 : vector<8x4xf32>
      %19 = arith.truncf %18 : vector<8x4xf32> to vector<8x4xbf16>
      %c0_19 = arith.constant 0 : index
      %c0_20 = arith.constant 0 : index
      %20 = vector.load %arg14[%c0_19, %c0_20] : memref<8x4xf32, #tpu.memory_space<vmem>>, vector<8x4xf32>
      %cst_21 = arith.constant 3.906250e-03 : f32
      %21 = vector.broadcast %cst_21 : f32 to vector<8x4xf32>
      %22 = arith.mulf %20, %21 : vector<8x4xf32>
      %23 = arith.truncf %22 : vector<8x4xf32> to vector<8x4xbf16>
      %c0_22 = arith.constant 0 : index
      %c0_23 = arith.constant 0 : index
      %24 = vector.load %arg4[%c0_22, %c0_23] : memref<4x128xbf16, #tpu.memory_space<vmem>>, vector<4x128xbf16>
      %cst_24 = arith.constant dense<0.000000e+00> : vector<8x128xf32>
      %25 = tpu.matmul %19, %24, %cst_24 {dimension_numbers = #tpu.dot_dimension_numbers<[1], [0], [0], [1], [0, 0, 1, 1], [], []>} : vector<8x4xbf16>, vector<4x128xbf16>, vector<8x128xf32> -> vector<8x128xf32>
      %c0_25 = arith.constant 0 : index
      %c0_26 = arith.constant 0 : index
      %26 = vector.load %arg5[%c0_25, %c0_26] : memref<1x128xf32, #tpu.memory_space<vmem>>, vector<1x128xf32>
      %27 = vector.broadcast %26 : vector<1x128xf32> to vector<8x128xf32>
      %28 = arith.addf %25, %27 : vector<8x128xf32>
      %29 = arith.truncf %28 : vector<8x128xf32> to vector<8x128xbf16>
      %c0_27 = arith.constant 0 : index
      %c0_28 = arith.constant 0 : index
      %30 = vector.load %arg8[%c0_27, %c0_28] : memref<128x128xbf16, #tpu.memory_space<vmem>>, vector<128x128xbf16>
      %cst_29 = arith.constant dense<0.000000e+00> : vector<8x128xf32>
      %31 = tpu.matmul %29, %30, %cst_29 {dimension_numbers = #tpu.dot_dimension_numbers<[1], [0], [0], [1], [0, 0, 1, 1], [], []>} : vector<8x128xbf16>, vector<128x128xbf16>, vector<8x128xf32> -> vector<8x128xf32>
      %c0_30 = arith.constant 0 : index
      %c0_31 = arith.constant 0 : index
      %32 = vector.load %arg9[%c0_30, %c0_31] : memref<1x128xf32, #tpu.memory_space<vmem>>, vector<1x128xf32>
      %33 = vector.broadcast %32 : vector<1x128xf32> to vector<8x128xf32>
      %34 = arith.addf %31, %33 : vector<8x128xf32>
      %cst_32 = arith.constant 0.000000e+00 : f32
      %35 = vector.broadcast %cst_32 : f32 to vector<8x128xf32>
      %36 = arith.maximumf %34, %35 : vector<8x128xf32>
      %37 = arith.truncf %36 : vector<8x128xf32> to vector<8x128xbf16>
      %c0_33 = arith.constant 0 : index
      %c0_34 = arith.constant 0 : index
      %38 = vector.load %arg10[%c0_33, %c0_34] : memref<128x128xbf16, #tpu.memory_space<vmem>>, vector<128x128xbf16>
      %cst_35 = arith.constant dense<0.000000e+00> : vector<8x128xf32>
      %39 = tpu.matmul %37, %38, %cst_35 {dimension_numbers = #tpu.dot_dimension_numbers<[1], [0], [0], [1], [0, 0, 1, 1], [], []>} : vector<8x128xbf16>, vector<128x128xbf16>, vector<8x128xf32> -> vector<8x128xf32>
      %c0_36 = arith.constant 0 : index
      %c0_37 = arith.constant 0 : index
      %40 = vector.load %arg11[%c0_36, %c0_37] : memref<1x128xf32, #tpu.memory_space<vmem>>, vector<1x128xf32>
      %41 = vector.broadcast %40 : vector<1x128xf32> to vector<8x128xf32>
      %42 = arith.addf %39, %41 : vector<8x128xf32>
      %c0_38 = arith.constant 0 : index
      %c0_39 = arith.constant 0 : index
      %43 = vector.load %arg6[%c0_38, %c0_39] : memref<4x128xbf16, #tpu.memory_space<vmem>>, vector<4x128xbf16>
      %cst_40 = arith.constant dense<0.000000e+00> : vector<8x128xf32>
      %44 = tpu.matmul %23, %43, %cst_40 {dimension_numbers = #tpu.dot_dimension_numbers<[1], [0], [0], [1], [0, 0, 1, 1], [], []>} : vector<8x4xbf16>, vector<4x128xbf16>, vector<8x128xf32> -> vector<8x128xf32>
      %c0_41 = arith.constant 0 : index
      %c0_42 = arith.constant 0 : index
      %45 = vector.load %arg7[%c0_41, %c0_42] : memref<1x128xf32, #tpu.memory_space<vmem>>, vector<1x128xf32>
      %46 = vector.broadcast %45 : vector<1x128xf32> to vector<8x128xf32>
      %47 = arith.addf %44, %46 : vector<8x128xf32>
      %48 = arith.mulf %42, %42 : vector<8x128xf32>
      %cst_43 = arith.constant dense<0.000000e+00> : vector<8xf32>
      %49 = vector.multi_reduction <add>, %48, %cst_43 [1] : vector<8x128xf32> to vector<8xf32>
      %50 = vector.shape_cast %49 : vector<8xf32> to vector<8x1xf32>
      %cst_44 = arith.constant 1.000000e-24 : f32
      %51 = vector.broadcast %cst_44 : f32 to vector<8x1xf32>
      %52 = arith.maximumf %50, %51 : vector<8x1xf32>
      %53 = math.rsqrt %52 : vector<8x1xf32>
      %54 = vector.broadcast %53 : vector<8x1xf32> to vector<8x128xf32>
      %55 = arith.mulf %42, %54 : vector<8x128xf32>
      %56 = arith.mulf %47, %47 : vector<8x128xf32>
      %cst_45 = arith.constant dense<0.000000e+00> : vector<8xf32>
      %57 = vector.multi_reduction <add>, %56, %cst_45 [1] : vector<8x128xf32> to vector<8xf32>
      %58 = vector.shape_cast %57 : vector<8xf32> to vector<8x1xf32>
      %cst_46 = arith.constant 1.000000e-24 : f32
      %59 = vector.broadcast %cst_46 : f32 to vector<8x1xf32>
      %60 = arith.maximumf %58, %59 : vector<8x1xf32>
      %61 = math.rsqrt %60 : vector<8x1xf32>
      %62 = vector.broadcast %61 : vector<8x1xf32> to vector<8x128xf32>
      %63 = arith.mulf %47, %62 : vector<8x128xf32>
      %64 = arith.mulf %55, %63 : vector<8x128xf32>
      %cst_47 = arith.constant dense<0.000000e+00> : vector<8xf32>
      %65 = vector.multi_reduction <add>, %64, %cst_47 [1] : vector<8x128xf32> to vector<8xf32>
      %66 = vector.shape_cast %65 : vector<8xf32> to vector<8x1xf32>
      %cst_48 = arith.constant 2.000000e+00 : f32
      %67 = vector.broadcast %cst_48 : f32 to vector<8x1xf32>
      %68 = arith.mulf %67, %66 : vector<8x1xf32>
      %cst_49 = arith.constant 2.000000e+00 : f32
      %69 = vector.broadcast %cst_49 : f32 to vector<8x1xf32>
      %70 = arith.subf %69, %68 : vector<8x1xf32>
      %c8_i32 = arith.constant 8 : i32
      %71 = arith.muli %arg0, %c8_i32 : i32
      %72 = tpu.iota {dimensions = array<i32: 0>} : vector<8x1xi32>
      %73 = vector.broadcast %71 : i32 to vector<8x1xi32>
      %74 = arith.addi %73, %72 : vector<8x1xi32>
      %c2_i32 = arith.constant 2 : i32
      %75 = vector.broadcast %c2_i32 : i32 to vector<8x1xi32>
      %76 = arith.cmpi slt, %74, %75 : vector<8x1xi32>
      %cst_50 = arith.constant 0.000000e+00 : f32
      %77 = vector.broadcast %cst_50 : f32 to vector<8x1xf32>
      %78 = arith.select %76, %70, %77 : vector<8x1xi1>, vector<8x1xf32>
      %79 = vector.shape_cast %78 : vector<8x1xf32> to vector<1x8x1xf32>
      %cst_51 = arith.constant dense<0.000000e+00> : vector<1xf32>
      %80 = vector.multi_reduction <add>, %79, %cst_51 [1, 2] : vector<1x8x1xf32> to vector<1xf32>
      %81 = vector.shape_cast %80 : vector<1xf32> to vector<1x1x1xf32>
      %82 = vector.extract %81[0, 0, 0] : f32 from vector<1x1x1xf32>
      %83 = vector.broadcast %82 : f32 to vector<1x8x128xf32>
      %c0_52 = arith.constant 0 : index
      %c0_53 = arith.constant 0 : index
      %c0_54 = arith.constant 0 : index
      %84 = vector.load %arg12[%c0_52, %c0_53, %c0_54] : memref<1x8x128xf32, #tpu.memory_space<vmem>>, vector<1x8x128xf32>
      tpu.vector_store %arg12[%c0_52, %c0_53, %c0_54], %83 {strides = array<i32>} : memref<1x8x128xf32, #tpu.memory_space<vmem>>, vector<1x8x128xf32>,
    } else {
    }
    return
  }
  func.func @transform_0(%arg0: i32, %arg1: i32) -> (i32, i32, i32) {
    %c0_i32 = arith.constant 0 : i32
    %c0_i32_0 = arith.constant 0 : i32
    return %arg0, %c0_i32, %arg1 : i32, i32, i32
  }
  func.func @transform_1(%arg0: i32, %arg1: i32) -> (i32, i32, i32) {
    %c0_i32 = arith.constant 0 : i32
    %c0_i32_0 = arith.constant 0 : i32
    return %arg0, %c0_i32, %arg1 : i32, i32, i32
  }
  func.func @transform_2(%arg0: i32, %arg1: i32) -> (i32, i32) {
    %c0_i32 = arith.constant 0 : i32
    %c0_i32_0 = arith.constant 0 : i32
    %c0_i32_1 = arith.constant 0 : i32
    return %c0_i32, %c0_i32_0 : i32, i32
  }
  func.func @transform_3(%arg0: i32, %arg1: i32) -> (i32, i32) {
    %c0_i32 = arith.constant 0 : i32
    %c0_i32_0 = arith.constant 0 : i32
    %c0_i32_1 = arith.constant 0 : i32
    return %c0_i32, %c0_i32_0 : i32, i32
  }
  func.func @transform_4(%arg0: i32, %arg1: i32) -> (i32, i32) {
    %c0_i32 = arith.constant 0 : i32
    %c0_i32_0 = arith.constant 0 : i32
    %c0_i32_1 = arith.constant 0 : i32
    return %c0_i32, %c0_i32_0 : i32, i32
  }
  func.func @transform_5(%arg0: i32, %arg1: i32) -> (i32, i32) {
    %c0_i32 = arith.constant 0 : i32
    %c0_i32_0 = arith.constant 0 : i32
    %c0_i32_1 = arith.constant 0 : i32
    return %c0_i32, %c0_i32_0 : i32, i32
  }
  func.func @transform_6(%arg0: i32, %arg1: i32) -> (i32, i32) {
    %c0_i32 = arith.constant 0 : i32
    %c0_i32_0 = arith.constant 0 : i32
    %c0_i32_1 = arith.constant 0 : i32
    return %c0_i32, %c0_i32_0 : i32, i32
  }
  func.func @transform_7(%arg0: i32, %arg1: i32) -> (i32, i32) {
    %c0_i32 = arith.constant 0 : i32
    %c0_i32_0 = arith.constant 0 : i32
    %c0_i32_1 = arith.constant 0 : i32
    return %c0_i32, %c0_i32_0 : i32, i32
  }
  func.func @transform_8(%arg0: i32, %arg1: i32) -> (i32, i32) {
    %c0_i32 = arith.constant 0 : i32
    %c0_i32_0 = arith.constant 0 : i32
    %c0_i32_1 = arith.constant 0 : i32
    return %c0_i32, %c0_i32_0 : i32, i32
  }
  func.func @transform_9(%arg0: i32, %arg1: i32) -> (i32, i32) {
    %c0_i32 = arith.constant 0 : i32
    %c0_i32_0 = arith.constant 0 : i32
    %c0_i32_1 = arith.constant 0 : i32
    return %c0_i32, %c0_i32_0 : i32, i32
  }
  func.func @transform_10(%arg0: i32, %arg1: i32) -> (i32, i32, i32) {
    %c0_i32 = arith.constant 0 : i32
    %c0_i32_0 = arith.constant 0 : i32
    %c0_i32_1 = arith.constant 0 : i32
    return %arg0, %c0_i32, %c0_i32_0 : i32, i32, i32
  }
}

</mosaic_0001>

<bundles_post_ra>
// kernel: simreg_loss.1
= control target key start
LH: loop header
LB: loop body
LE: loop exit
PB: predicated region body
PF: predicated region fallthrough
CT: control target
= control target key end

     0   :  { %s1291_s13 = smov 0   ;;  %s1293_s14 = smov 0   ;;  %s1494_s0 = inlined_call_operand.vmem [shape: f32[8,4,256], index: 0, kind: input, shape index: {}]   ;;  %s1495_s1 = inlined_call_operand.vmem [shape: f32[8,4,256], index: 1, kind: input, shape index: {}]   ;;  %s1496_s2 = inlined_call_operand.vmem [shape: bf16[4,128], index: 2, kind: input, shape index: {}]   ;;  %s1497_s3 = inlined_call_operand.vmem [shape: f32[1,128], index: 3, kind: input, shape index: {}]   ;;  %s1498_s4 = inlined_call_operand.vmem [shape: bf16[4,128], index: 4, kind: input, shape index: {}]   ;;  %s1499_s5 = inlined_call_operand.vmem [shape: f32[1,128], index: 5, kind: input, shape index: {}]   ;;  %s1500_s6 = inlined_call_operand.vmem [shape: bf16[128,128], index: 6, kind: input, shape index: {}]   ;;  %s1501_s7 = inlined_call_operand.vmem [shape: f32[1,128], index: 7, kind: input, shape index: {}]   ;;  %s1502_s8 = inlined_call_operand.vmem [shape: bf16[128,128], index: 8, kind: input, shape index: {}]   ;;  %s1503_s9 = inlined_call_operand.vmem [shape: f32[1,128], index: 9, kind: input, shape index: {}]   ;;  %s1504_s10 = inlined_call_operand.vmem [shape: f32[1,8,128], index: 10, kind: output, shape index: {}]  }
   0x1   :  { %s1295_s15 = smov 0   ;;  %s1297_s16 = smov 0  }
   0x2   :  { %s1299_s17 = smov 0  }
   0x3 LB: > { %s29_s18 = sadd.s32 1, %s1229_s16  ;;  %p48_p1 = scmp.ne.s32.totalorder %s1221_s14, %s1217_s13  ;;  %s1233_s17 = sphi %s1299_s17, %s20_s17   ;;  %s1229_s16 = sphi %s1297_s16, %s1509_s16   ;;  %s1225_s15 = sphi %s1295_s15, %s1508_s15   ;;  %s1221_s14 = sphi %s1293_s14, %s1507_s14   ;;  %s1217_s13 = sphi %s1291_s13, %s1506_s13  }
   0x4   : > { %p30_p0 = scmp.ge.s32.totalorder %s29_s18, 2  ;;  %p49_p2 = scmp.eq.s32.totalorder %s1233_s17, 0 }
   0x5   : > { %s41_s21 = sadd.s32 1, %s1221_s14  ;;  %p1049_p5 = scmp.ge.s32.totalorder %s1233_s17, 2 }
   0x6   : > { %s1511_s18 = smov (%p30_p0, %s29_s18), 0  ;;  %p1322_p3 = por %p49_p2, %p48_p1 }
   0x7   : > { %s37_s20 = ssub.s32 %s1229_s16, %s1511_s18  ;;  %320 = sbr.rel (%p1049_p5) target bundleno = 36 (0x24), region = 48 }
   0x8   : > { %p39_p4 = scmp.eq.s32.totalorder %s37_s20, 0 }
   0xa   : > { %s1330_s22 = scalar_select %p39_p4, %s1221_s14, %s41_s21  }
   0xc   : > { %323 = sbr.rel (!%p1322_p3) target bundleno = 24 (0x18), region = 52  ;;  %s325_s23 = sand.u32 (%p1322_p3), 1, %s1221_s14  }
   0xd   : > { %s1051_s24 = sshll.u32 (%p1322_p3), %s1229_s16, 2  ;;  %s1050_s25 = sshll.u32 (%p1322_p3), %s325_s23, 5 }
   0xe   : > { %s332_s28 = scalar_lea.vmem (%p1322_p3), %s1494_s0, %s1051_s24  ;;  %s327_s29 = scalar_lea.vmem (%p1322_p3), [#allocation4], %s1050_s25 }
   0xf   : > { %v349_v0 = vld [vmem:[%s332_s28] sm:$0xf] (%p1322_p3)  ;;  %v351_v1 = vld [vmem:[%s332_s28 + $0x8] sm:$0xf] (%p1322_p3)  ;;  %v353_v2 = vld [vmem:[%s332_s28 + $0x10] sm:$0xf] (%p1322_p3) }
  0x10   : > { %350 = vst [vmem:[%s327_s29] sm:$0xf] (%p1322_p3), %v349_v0  ;;  %v355_v3 = vld [vmem:[%s332_s28 + $0x18] sm:$0xf] (%p1322_p3)  ;;  %v357_v4 = vld [vmem:[%s332_s28 + $0x20] sm:$0xf] (%p1322_p3) }
  0x11   : > { %352 = vst [vmem:[%s327_s29 + $0x4] sm:$0xf] %v351_v1  ;;  %v359_v5 = vld [vmem:[%s332_s28 + $0x28] sm:$0xf]  ;;  %v361_v6 = vld [vmem:[%s332_s28 + $0x30] sm:$0xf] }
  0x12   : > { %354 = vst [vmem:[%s327_s29 + $0x8] sm:$0xf] %v353_v2  ;;  %v363_v7 = vld [vmem:[%s332_s28 + $0x38] sm:$0xf] }
  0x13   : > { %356 = vst [vmem:[%s327_s29 + $0xc] sm:$0xf] %v355_v3 }
  0x14   : > { %358 = vst [vmem:[%s327_s29 + $0x10] sm:$0xf] %v357_v4 }
  0x15   : > { %360 = vst [vmem:[%s327_s29 + $0x14] sm:$0xf] %v359_v5 }
  0x16   : > { %362 = vst [vmem:[%s327_s29 + $0x18] sm:$0xf] %v361_v6 }
  0x17   : > { %364 = vst [vmem:[%s327_s29 + $0x1c] sm:$0xf] %v363_v7 }
  0x18 PF: > { %404 = sbr.rel (!%p1322_p3) target bundleno = 36 (0x24), region = 93  ;;  %s406_s30 = sand.u32 (%p1322_p3), 1, %s1221_s14  }
  0x19   : > { %s1053_s11 = sshll.u32 (%p1322_p3), %s1229_s16, 2  ;;  %s1052_s12 = sshll.u32 (%p1322_p3), %s406_s30, 5 }
  0x1a   : > { %s413_s23 = scalar_lea.vmem (%p1322_p3), %s1495_s1, %s1053_s11  ;;  %s408_s24 = scalar_lea.vmem (%p1322_p3), [#allocation5], %s1052_s12 }
  0x1b   : > { %v430_v8 = vld [vmem:[%s413_s23] sm:$0xf] (%p1322_p3)  ;;  %v432_v9 = vld [vmem:[%s413_s23 + $0x8] sm:$0xf] (%p1322_p3)  ;;  %v434_v10 = vld [vmem:[%s413_s23 + $0x10] sm:$0xf] (%p1322_p3) }
  0x1c   : > { %431 = vst [vmem:[%s408_s24] sm:$0xf] (%p1322_p3), %v430_v8  ;;  %v436_v11 = vld [vmem:[%s413_s23 + $0x18] sm:$0xf] (%p1322_p3)  ;;  %v438_v12 = vld [vmem:[%s413_s23 + $0x20] sm:$0xf] (%p1322_p3) }
  0x1d   : > { %433 = vst [vmem:[%s408_s24 + $0x4] sm:$0xf] %v432_v9  ;;  %v440_v13 = vld [vmem:[%s413_s23 + $0x28] sm:$0xf]  ;;  %v442_v14 = vld [vmem:[%s413_s23 + $0x30] sm:$0xf] }
  0x1e   : > { %435 = vst [vmem:[%s408_s24 + $0x8] sm:$0xf] %v434_v10  ;;  %v444_v15 = vld [vmem:[%s413_s23 + $0x38] sm:$0xf] }
  0x1f   : > { %437 = vst [vmem:[%s408_s24 + $0xc] sm:$0xf] %v436_v11 }
  0x20   : > { %439 = vst [vmem:[%s408_s24 + $0x10] sm:$0xf] %v438_v12 }
  0x21   : > { %441 = vst [vmem:[%s408_s24 + $0x14] sm:$0xf] %v440_v13 }
  0x22   : > { %443 = vst [vmem:[%s408_s24 + $0x18] sm:$0xf] %v442_v14 }
  0x23   : > { %445 = vst [vmem:[%s408_s24 + $0x1c] sm:$0xf] %v444_v15 }
  0x24 PF: > { %p1054_p6 = scmp.ge.s32.totalorder %s1233_s17, 1  ;;  %p484_p7 = scmp.lt.s32.totalorder %s1233_s17, 3 }
  0x26   : > { %p485_p8 = pnand %p1054_p6, %p484_p7 }
  0x27   : > { %s491_s19 = sand.u32 (!%p485_p8), 1, %s1217_s13   ;;  %p1057_p9 = scmp.ne.s32.totalorder (!%p485_p8), %s1225_s15, 0 }
  0x28   : > { %488 = sbr.rel (%p485_p8) target bundleno = 1072 (0x430), region = 134  ;;  %s1055_s25 = sshll.u32 (!%p485_p8), %s491_s19, 5 }
  0x29   : > { %s1350_s26 = scalar_lea.vmem (!%p485_p8), [#allocation4], %s1055_s25  ;;  %s1352_s27 = scalar_lea.vmem (!%p485_p8), [#allocation5], %s1055_s25 }
  0x2d   : > { %548 = sbr.rel (%p1057_p9) target bundleno = 53 (0x35), region = 146 }
  0x32   : > { %vm549_vm0 = vcmask 31744   ;;  %v1235_v16 = vmov 0.0  }
  0x33   : > { %550 = vst.msk [vmem:[#allocation2] sm:$0xff] %vm549_vm0, %v1235_v16 }
  0x34   : > { %551 = vst.msk [vmem:[#allocation3] sm:$0xff] %vm549_vm0, %v1235_v16 }
  0x35 PF: > { %vm561_vm1 = vcmask 1043456   ;;  %v623_v17 = vld [vmem:[%s1352_s27] sm:$0xf]  ;;  %v555_v21 = vld [vmem:[%s1350_s26 + $0x8] sm:$0xf]  ;;  %v594_v55 = vlaneseq  ;;  %vm604_vm2 = vcmask 1041409  }
  0x36   : > { %v553_v18 = vld [vmem:[%s1350_s26] sm:$0xf]  ;;  %v631_v19 = vsel %vm561_vm1, %v623_v17, 0.0  ;;  %v568_v22 = vsel %vm561_vm1, %v555_v21, 0.0  ;;  %v624_v23 = vld [vmem:[%s1352_s27 + $0x4] sm:$0xf] }
  0x37   : > { %v562_v20 = vsel %vm561_vm1, %v553_v18, 0.0  ;;  %632 = vadd.xlane.f32.xlu1 %v631_v19  ;;  %569 = vadd.xlane.f32.xlu2 %v568_v22  ;;  %v554_v24 = vld [vmem:[%s1350_s26 + $0x4] sm:$0xf]  ;;  %v625_v25 = vld [vmem:[%s1352_s27 + $0x8] sm:$0xf]  ;;  %v634_v26 = vsel %vm561_vm1, %v624_v23, 0.0 }
  0x38   : > { %563 = vadd.xlane.f32.xlu0 %v562_v20  ;;  %v565_v27 = vsel %vm561_vm1, %v554_v24, 0.0  ;;  %v637_v28 = vsel %vm561_vm1, %v625_v25, 0.0  ;;  %v626_v29 = vld [vmem:[%s1352_s27 + $0xc] sm:$0xf]  ;;  %v557_v31 = vld [vmem:[%s1350_s26 + $0x10] sm:$0xf] }
  0x39   : > { %v556_v30 = vld [vmem:[%s1350_s26 + $0xc] sm:$0xf]  ;;  %v640_v32 = vsel %vm561_vm1, %v626_v29, 0.0  ;;  %v574_v34 = vsel %vm561_vm1, %v557_v31, 0.0  ;;  %v558_v35 = vld [vmem:[%s1350_s26 + $0x14] sm:$0xf] }
  0x3a   : > { %v571_v33 = vsel %vm561_vm1, %v556_v30, 0.0  ;;  %v627_v36 = vld [vmem:[%s1352_s27 + $0x10] sm:$0xf]  ;;  %v628_v37 = vld [vmem:[%s1352_s27 + $0x14] sm:$0xf]  ;;  %v577_v38 = vsel %vm561_vm1, %v558_v35, 0.0 }
  0x3b   : > { %v643_v39 = vsel %vm561_vm1, %v627_v36, 0.0  ;;  %v646_v40 = vsel %vm561_vm1, %v628_v37, 0.0  ;;  %v629_v41 = vld [vmem:[%s1352_s27 + $0x18] sm:$0xf]  ;;  %v560_v43 = vld [vmem:[%s1350_s26 + $0x1c] sm:$0xf] }
  0x3c   : > { %v559_v42 = vld [vmem:[%s1350_s26 + $0x18] sm:$0xf]  ;;  %v649_v44 = vsel %vm561_vm1, %v629_v41, 0.0  ;;  %v583_v46 = vsel %vm561_vm1, %v560_v43, 0.0  ;;  %v630_v47 = vld [vmem:[%s1352_s27 + $0x1c] sm:$0xf] }
  0x3d   : > { %v580_v45 = vsel %vm561_vm1, %v559_v42, 0.0  ;;  %v652_v48 = vsel %vm561_vm1, %v630_v47, 0.0  ;;  %v595_v59 = vand.u32 127, %v594_v55  ;;  %vm606_vm3 = vcmask 1042434   ;;  %v552_v19 = vld [vmem:[#allocation2] sm:$0xff]  ;;  %p1058_p10 = scmp.ne.s32.totalorder %s1225_s15, 1 }
  0x3e   : > { %vm608_vm4 = vcmask 1043459   ;;  %vm610_vm5 = vcmask 1044484   ;;  %vm612_vm6 = vcmask 1045509   ;;  %vm614_vm7 = vcmask 1046534  }
  0x3f   : > { %635 = vadd.xlane.f32.xlu1 %v634_v26  ;;  %638 = vadd.xlane.f32.xlu2 %v637_v28  ;;  %vm616_vm8 = vcmask 1047559   ;;  %vm620_vm9 = vcmask 31744  }
  0x40   : > { %566 = vadd.xlane.f32.xlu0 %v565_v27 }
  0x47   : > { %641 = vadd.xlane.f32.xlu1 %v640_v32  ;;  %575 = vadd.xlane.f32.xlu2 %v574_v34  ;;  %v622_v32 = vld [vmem:[#allocation3] sm:$0xff] }
  0x48   : > { %572 = vadd.xlane.f32.xlu0 %v571_v33 }
  0x4f   : > { %578 = vadd.xlane.f32.xlu1 %v577_v38  ;;  %647 = vadd.xlane.f32.xlu2 %v646_v40 }
  0x50   : > { %644 = vadd.xlane.f32.xlu0 %v643_v39 }
  0x57   : > { %650 = vadd.xlane.f32.xlu1 %v649_v44  ;;  %584 = vadd.xlane.f32.xlu2 %v583_v46 }
  0x58   : > { %581 = vadd.xlane.f32.xlu0 %v580_v45 }
  0x60   : > { %653 = vadd.xlane.f32.xlu0 %v652_v48 }
  0xaa   : > { %v633_v49 = vpop.xlane.xlu1 %632  ;;  %v570_v51 = vpop.xlane.xlu2 %569 }
  0xab   : > { %v564_v50 = vpop.xlane.xlu0 %563  ;;  %v598_v63 = vperm.slane %v570_v51, %v595_v59  ;;  %v663_v4 = vperm.slane %v633_v49, %v595_v59 }
  0xac   : > { %v596_v61 = vperm.slane %v564_v50, %v595_v59 }
  0xb2   : > { %v636_v52 = vpop.xlane.xlu1 %635  ;;  %v639_v54 = vpop.xlane.xlu2 %638 }
  0xb3   : > { %v567_v53 = vpop.xlane.xlu0 %566  ;;  %v664_v5 = vperm.slane %v636_v52, %v595_v59  ;;  %v665_v10 = vperm.slane %v639_v54, %v595_v59 }
  0xb4   : > { %v597_v60 = vperm.slane %v567_v53, %v595_v59 }
  0xb5   : > { %v671_v12 = vsel %vm604_vm2, %v664_v5, %v663_v4 }
  0xb6   : > { %v605_v2 = vsel %vm604_vm2, %v597_v60, %v596_v61  ;;  %v672_v23 = vsel %vm606_vm3, %v665_v10, %v671_v12 }
  0xb7   : > { %v607_v6 = vsel %vm606_vm3, %v598_v63, %v605_v2 }
  0xba   : > { %v642_v56 = vpop.xlane.xlu1 %641  ;;  %v576_v58 = vpop.xlane.xlu2 %575 }
  0xbb   : > { %v573_v57 = vpop.xlane.xlu0 %572  ;;  %v600_v7 = vperm.slane %v576_v58, %v595_v59  ;;  %v666_v13 = vperm.slane %v642_v56, %v595_v59 }
  0xbc   : > { %v599_v3 = vperm.slane %v573_v57, %v595_v59 }
  0xbd   : > { %v673_v25 = vsel %vm608_vm4, %v666_v13, %v672_v23 }
  0xbe   : > { %v609_v8 = vsel %vm608_vm4, %v599_v3, %v607_v6 }
  0xbf   : > { %v611_v14 = vsel %vm610_vm5, %v600_v7, %v609_v8 }
  0xc2   : > { %v579_v0 = vpop.xlane.xlu1 %578  ;;  %v648_v1 = vpop.xlane.xlu2 %647 }
  0xc3   : > { %v645_v62 = vpop.xlane.xlu0 %644  ;;  %v601_v9 = vperm.slane %v579_v0, %v595_v59  ;;  %v668_v26 = vperm.slane %v648_v1, %v595_v59 }
  0xc4   : > { %v667_v18 = vperm.slane %v645_v62, %v595_v59 }
  0xc5   : > { %v613_v17 = vsel %vm612_vm6, %v601_v9, %v611_v14 }
  0xc6   : > { %v674_v28 = vsel %vm610_vm5, %v667_v18, %v673_v25 }
  0xc7   : > { %v675_v31 = vsel %vm612_vm6, %v668_v26, %v674_v28 }
  0xca   : > { %v585_v16 = vpop.xlane.xlu2 %584  ;;  %v651_v21 = vpop.xlane.xlu1 %650 }
  0xcb   : > { %v582_v11 = vpop.xlane.xlu0 %581  ;;  %v603_v20 = vperm.slane %v585_v16, %v595_v59  ;;  %v669_v29 = vperm.slane %v651_v21, %v595_v59 }
  0xcc   : > { %v602_v15 = vperm.slane %v582_v11, %v595_v59 }
  0xcd   : > { %v676_v34 = vsel %vm614_vm7, %v669_v29, %v675_v31 }
  0xce   : > { %v615_v22 = vsel %vm614_vm7, %v602_v15, %v613_v17 }
  0xcf   : > { %v617_v24 = vsel %vm616_vm8, %v603_v20, %v615_v22 }
  0xd0   : > { %v619_v27 = vadd.f32 %v617_v24, %v552_v19 }
  0xd2   : > { %621 = vst.msk [vmem:[#allocation2] sm:$0xff] %vm620_vm9, %v619_v27 }
  0xd3   : > { %v654_v30 = vpop.xlane.xlu0 %653 }
  0xd4   : > { %v670_v33 = vperm.slane %v654_v30, %v595_v59 }
  0xd5   : > { %684 = sbr.rel (%p1058_p10) target bundleno = 1072 (0x430), region = 150 }
  0xd6   : > { %v677_v35 = vsel %vm616_vm8, %v670_v33, %v676_v34 }
  0xd7   : > { %v679_v36 = vadd.f32 %v677_v35, %v622_v32 }
  0xd9   : > { %680 = vst.msk [vmem:[#allocation3] sm:$0xff] %vm620_vm9, %v679_v36 }
  0xda   : > { %v691_v37 = vld [vmem:[%s1496_s2] sm:$0x3]  ;;  %vm699_vm10 = vcmask 1041408   ;;  %v1135_v39 = vld [vmem:[%s1500_s6 + $0x38] sm:$0xff]  ;;  %v1134_v42 = vld [vmem:[%s1500_s6 + $0x30] sm:$0xff]  ;;  %vm947_vm2 = vcmask 7168  }
  0xdb   : > { %v685_v38 = vld [vmem:[#allocation2] sm:$0xff]  ;;  %v701_v40 = vsel %vm699_vm10, %v691_v37, 0  ;;  %785 = vmatpush.bf16.msra.mxu1 %v1135_v39  ;;  %v1133_v44 = vld [vmem:[%s1500_s6 + $0x28] sm:$0xff]  ;;  %v1131_v46 = vld [vmem:[%s1500_s6 + $0x18] sm:$0xff] }
  0xdc   : > { %v686_v41 = vmul.f32 0.00390625, %v685_v38  ;;  %710 = vmatpush.bf16.msra.mxu0 %v701_v40  ;;  %v1132_v45 = vld [vmem:[%s1500_s6 + $0x20] sm:$0xff]  ;;  %v1130_v47 = vld [vmem:[%s1500_s6 + $0x10] sm:$0xff]  ;;  %v1129_v48 = vld [vmem:[%s1500_s6 + $0x8] sm:$0xff] }
  0xdd   : > { %v1128_v49 = vld [vmem:[%s1500_s6] sm:$0xff]  ;;  %v1143_v50 = vld [vmem:[%s1502_s8 + $0x38] sm:$0xff]  ;;  %v1142_v51 = vld [vmem:[%s1502_s8 + $0x30] sm:$0xff] }
  0xde   : > { %v687_v43 = vpack.c.bf16 %v686_v41, %v686_v41  ;;  %868 = vmatpush.bf16.msra.mxu2 %v1143_v50  ;;  %v1141_v52 = vld [vmem:[%s1502_s8 + $0x28] sm:$0xff]  ;;  %v1140_v53 = vld [vmem:[%s1502_s8 + $0x20] sm:$0xff]  ;;  %v1139_v54 = vld [vmem:[%s1502_s8 + $0x18] sm:$0xff] }
  0xdf   : > { %786 = vmatpush.bf16.msra.mxu1 %v1134_v42  ;;  %v1138_v56 = vld [vmem:[%s1502_s8 + $0x10] sm:$0xff]  ;;  %v1187_v57 = vld [vmem:[%s1497_s3] ss:$0 sm:$0xff]  ;;  %v1137_v62 = vld [vmem:[%s1502_s8 + $0x8] sm:$0xff]  ;;  %v942_v42 = vshrl.u32 %v594_v55, 7 }
  0xe0   : > { %1059 = vmatmul.msk.bf16.vlgmr.msra.gmra.mxu0 %vm620_vm9, %v687_v43  ;;  %v1136_v63 = vld [vmem:[%s1502_s8] sm:$0xff]  ;;  %v688_v1 = vld [vmem:[#allocation3] sm:$0xff] }
  0xe1   : > { %v881_v0 = vld [vmem:[%s1498_s4] sm:$0x3]  ;;  %v689_v3 = vmul.f32 0.00390625, %v688_v1  ;;  %vm945_vm1 = vcmp.lt.s32.totalorder %v942_v42, 2 }
  0xe2   : > { %869 = vmatpush.bf16.msra.mxu2 %v1142_v51  ;;  %v890_v2 = vsel %vm699_vm10, %v881_v0, 0  ;;  %v1188_v5 = vld [vmem:[%s1501_s7] ss:$0 sm:$0xff] }
  0xe3   : > { %787 = vmatpush.bf16.msra.mxu1 %v1133_v44  ;;  %899 = vmatpush.bf16.msra.mxu3 %v890_v2  ;;  %v690_v4 = vpack.c.bf16 %v689_v3, %v689_v3  ;;  %v1189_v13 = vld [vmem:[%s1503_s9] ss:$0 sm:$0xff] }
  0xe4   : > { %v1190_v16 = vld [vmem:[%s1499_s5] ss:$0 sm:$0xff] }
  0xe6   : > { %870 = vmatpush.bf16.msra.mxu2 %v1141_v52  ;;  %1124 = vmatmul.msk.bf16.vlgmr.msra.gmra.mxu3 %vm620_vm9, %v690_v4 }
  0xe7   : > { %788 = vmatpush.bf16.msra.mxu1 %v1132_v45 }
  0xea   : > { %871 = vmatpush.bf16.msra.mxu2 %v1140_v53 }
  0xeb   : > { %789 = vmatpush.bf16.msra.mxu1 %v1131_v46 }
  0xee   : > { %872 = vmatpush.bf16.msra.mxu2 %v1139_v54 }
  0xef   : > { %790 = vmatpush.bf16.msra.mxu1 %v1130_v47 }
  0xf2   : > { %873 = vmatpush.bf16.msra.mxu2 %v1138_v56 }
  0xf3   : > { %791 = vmatpush.bf16.msra.mxu1 %v1129_v48 }
  0xf6   : > { %874 = vmatpush.bf16.msra.mxu2 %v1137_v62 }
  0xf7   : > { %792 = vmatpush.bf16.msra.mxu1 %v1128_v49 }
  0xfa   : > { %875 = vmatpush.bf16.msra.mxu2 %v1136_v63 }
 0x15d   : > { %v712_v58 = vpop.f32.mrf.mxu0 }
 0x15e   : > { %v713_v59 = vadd.f32 %v1187_v57, %v712_v58 }
 0x160   : > { %v716_v60 = vpack.c.bf16 %v713_v59, %v713_v59 }
 0x162   : > { %793 = vmatmul.bf16.vlgmr.msra.gmra.mxu1 %v716_v60 }
 0x165   : > { %v714_v61 = vpop.f32.mrf.mxu0 }
 0x169   : > { %v901_v11 = vpop.f32.mrf.mxu3 }
 0x16a   : > { %v902_v18 = vadd.f32 %v1190_v16, %v901_v11 }
 0x16c   : > { %v920_v20 = vmul.f32 %v902_v18, %v902_v18 }
 0x171   : > { %v903_v12 = vpop.f32.mrf.mxu3 }
 0x1df   : > { %v794_v6 = vpop.f32.mrf.mxu1 }
 0x1e0   : > { %v795_v7 = vadd.f32 %v1188_v5, %v794_v6 }
 0x1e2   : > { %v798_v8 = vmax.f32 %v795_v7, 0.0 }
 0x1e4   : > { %v799_v9 = vpack.c.bf16 %v798_v8, %v798_v8 }
 0x1e6   : > { %876 = vmatmul.bf16.vlgmr.msra.gmra.mxu2 %v799_v9 }
 0x1e7   : > { %v796_v10 = vpop.f32.mrf.mxu1 }
 0x269   : > { %v877_v14 = vpop.f32.mrf.mxu2 }
 0x26a   : > { %v878_v15 = vadd.f32 %v1189_v13, %v877_v14 }
 0x26c   : > { %v905_v17 = vmul.f32 %v878_v15, %v878_v15 }
 0x26e   : > { %906 = vadd.xlane.f32.xlu0 %v905_v17 }
 0x271   : > { %v879_v19 = vpop.f32.mrf.mxu2 }
 0x276   : > { %921 = vadd.xlane.f32.xlu0 %v920_v20 }
 0x2e1   : > { %v907_v21 = vpop.xlane.xlu0 %906 }
 0x2e2   : > { %v908_v22 = vmax.f32 %v907_v21, 1e-24 }
 0x2e4   : > { %1191 = vrsqrt.f32 %v908_v22  ;;  %vm915_vm12 = vweird.f32 %v908_v22 }
 0x2e9   : > { %v922_v23 = vpop.xlane.xlu0 %921 }
 0x2ea   : > { %v1192_v24 = vpop.eup %1191  ;;  %v923_v25 = vmax.f32 %v922_v23, 1e-24 }
 0x2eb   : > { %v910_v26 = vmul.f32 %v1192_v24, %v908_v22  ;;  %vm916_vm11 = vweird.f32 %v1192_v24 }
 0x2ec   : > { %1193 = vrsqrt.f32 %v923_v25  ;;  %vm917_vm14 = vmor %vm915_vm12, %vm916_vm11  ;;  %vm930_vm15 = vweird.f32 %v923_v25 }
 0x2ed   : > { %v911_v27 = vmul.f32 %v1192_v24, %v910_v26 }
 0x2ef   : > { %v912_v28 = vmul.f32 0.5, %v911_v27 }
 0x2f1   : > { %v913_v30 = vsub.f32 1.5, %v912_v28 }
 0x2f2   : > { %v1194_v29 = vpop.eup %1193 }
 0x2f3   : > { %v925_v31 = vmul.f32 %v1194_v29, %v923_v25  ;;  %v914_v34 = vmul.f32 %v1192_v24, %v913_v30  ;;  %vm931_vm13 = vweird.f32 %v1194_v29 }
 0x2f4   : > { %vm932_vm0 = vmor %vm930_vm15, %vm931_vm13 }
 0x2f5   : > { %v926_v32 = vmul.f32 %v1194_v29, %v925_v31  ;;  %v918_v36 = vsel %vm917_vm14, %v1192_v24, %v914_v34 }
 0x2f6   : > { %v919_v39 = vmul.f32 %v918_v36, %v878_v15 }
 0x2f7   : > { %v927_v33 = vmul.f32 0.5, %v926_v32 }
 0x2f9   : > { %v928_v35 = vsub.f32 1.5, %v927_v33 }
 0x2fb   : > { %v929_v37 = vmul.f32 %v1194_v29, %v928_v35 }
 0x2fd   : > { %v933_v38 = vsel %vm932_vm0, %v1194_v29, %v929_v37 }
 0x2fe   : > { %v934_v40 = vmul.f32 %v933_v38, %v902_v18 }
 0x300   : > { %v935_v41 = vmul.f32 %v934_v40, %v919_v39 }
 0x302   : > { %936 = vadd.xlane.f32.xlu1 %v935_v41 }
 0x375   : > { %v937_v43 = vpop.xlane.xlu1 %936 }
 0x376   : > { %v938_v44 = vmul.f32 2.0, %v937_v43 }
 0x378   : > { %v939_v45 = vsub.f32 2.0, %v938_v44 }
 0x37a   : > { %v946_v46 = vsel %vm945_vm1, %v939_v45, 0.0 }
 0x37b   : > { %v948_v47 = vsel %vm947_vm2, %v946_v46, 0.0 }
 0x37c   : > { %949 = vadd.xlane.f32.xlu1 %v948_v47 }
 0x3ef   : > { %v950_v48 = vpop.xlane.xlu1 %949 }
 0x3f0   : > { %v951_v49 = vrot.slane %v950_v48, 4 }
 0x3f2   : > { %v952_v50 = vadd.f32 %v951_v49, %v950_v48 }
 0x3f4   : > { %v953_v51 = vrot.slane %v952_v50, 2 }
 0x3f6   : > { %v954_v52 = vadd.f32 %v953_v51, %v952_v50 }
 0x3f8   : > { %v955_v53 = vrot.slane %v954_v52, 1 }
 0x3fa   : > { %v956_v54 = vadd.f32 %v955_v53, %v954_v52 }
 0x3fc   : > { %1144 = vpush %v956_v54 }
 0x42d   : > { %s1145_s27 = spop %1144 }
 0x42e   : > { %v958_v56 = vstv %s1145_s27 }
 0x42f   : > { %959 = vst [vmem:[%s1504_s10] sm:$0xff] %v958_v56 }
 0x430 PF: > { %s20_s17 = sadd.s32 1, %s1233_s17   ;;  %s1506_s13 = smov %s1221_s14 }
 0x431   : > { %p17_p11 = scmp.ge.s32.totalorder %s20_s17, 4   ;;  %s1507_s14 = smov %s1330_s22 }
 0x432   : > { %s1508_s15 = smov %s1229_s16  ;;  %s1509_s16 = smov %s1511_s18 }
 0x433   :  { %19 = sbr.rel (!%p17_p11) target bundleno = 3 (0x3), region = 193 }

</bundles_post_ra>
